<compile_context>
chip_gen: v5e
topology: v5e:2x2
jax: 0.10.0
libtpu: 0.0.40
codegen_flags: <defaults>
</compile_context>

<pallas_src>
import functools

import jax
import jax.numpy as jnp
from jax.experimental import pallas as pl
from jax.experimental.pallas import tpu as pltpu

GAMMA = 2.0  # FocalLoss(gamma=2.0); specialized to an explicit square below.

_MiB = 1024 * 1024


def _vmem_capacity_bytes():
    """Physical VMEM per core; falls back to the smallest (v7x, 64 MiB)."""
    try:
        return int(pltpu.get_tpu_info().vmem_capacity_bytes)
    except Exception:  # pragma: no cover - conservative fallback
        return 64 * _MiB


def _plan_tiling(n, c, logits_itemsize):
    """Byte-driven batch-tile size + scoped VMEM limit to request.

    Accounts for: double-buffered logits tiles (native dtype), the
    double-buffered (tile_n, 1) int32 targets column (lane-padded to 128 lanes
    in VMEM -> 1024 B/row!), and ~4 f32 (tile_n, C) in-kernel temporaries.
    """
    vmem_cap = _vmem_capacity_bytes()
    # ~3/4 of physical VMEM, capped: v5e/v6e (128 MiB) -> 96 MiB, v7x (64) -> 48 MiB.
    vmem_limit = min((vmem_cap * 3) // 4, 96 * _MiB)
    budget = vmem_limit - 8 * _MiB  # headroom for alpha/outputs/misc
    per_row = (
        2 * c * logits_itemsize   # logits double-buffer (native dtype)
        + 2 * 128 * 4             # targets double-buffer, lane-padded int32 column
        + 4 * c * 4               # f32 upcast / exp / onehot / misc temporaries
    )
    t = max(16, budget // per_row)
    t = (t // 16) * 16            # sublane-aligned (covers bf16 packing too)
    t = min(t, 32768)             # sanity cap only (review: row cap removed/raised)
    if n <= t:
        t = n                     # single tile: block == full array dims, always legal
    return int(t), int(vmem_limit)


def _focal_loss_kernel(logits_ref, targets_ref, alpha_ref, out_ref, *,
                       n_total, tile_n):
    i = pl.program_id(0)

    logits = logits_ref[...].astype(jnp.float32)      # (tile_n, C)
    tgt = targets_ref[...]                            # (tile_n, 1) int32
    alpha = alpha_ref[...].astype(jnp.float32)        # (1, C)
    tn, c = logits.shape

    # one-hot of targets via broadcasted iota over the class (lane) axis
    class_ids = jax.lax.broadcasted_iota(jnp.int32, (tn, c), 1)
    onehot = (class_ids == tgt).astype(jnp.float32)   # (tile_n, C)

    # numerically stable cross entropy; reuse exp(logits - m) for pt (no exp(-ce))
    m = jnp.max(logits, axis=-1, keepdims=True)                        # (tn, 1)
    exp_shifted = jnp.exp(logits - m)                                  # (tn, C)
    sum_exp = jnp.sum(exp_shifted, axis=-1, keepdims=True)             # (tn, 1)
    tgt_logit = jnp.sum(onehot * logits, axis=-1, keepdims=True)       # (tn, 1)
    tgt_exp = jnp.sum(onehot * exp_shifted, axis=-1, keepdims=True)    # (tn, 1)

    ce = (m - tgt_logit) + jnp.log(sum_exp)                            # (tn, 1)
    pt = tgt_exp * pl.reciprocal(sum_exp, approx=False)                # (tn, 1)

    # focal loss: (1 - pt)^2 * ce (gamma == 2.0 -> explicit square, no pow)
    u = 1.0 - pt
    focal = u * u * ce

    # alpha_t = alpha[targets] via one-hot contraction (no gather primitive)
    alpha_t = jnp.sum(onehot * alpha, axis=-1, keepdims=True)
    focal = alpha_t * focal

    # mask rows of the (possibly padded) last tile that fall beyond N;
    # jnp.where is a select, so NaN/Inf garbage from OOB rows is discarded.
    row_ids = i * tile_n + jax.lax.broadcasted_iota(jnp.int32, (tn, 1), 0)
    focal = jnp.where(row_ids < n_total, focal, 0.0)

    # per-tile partial sum, written lane-dense; final sum / N happens in XLA
    tile_sum = jnp.sum(focal, axis=0, keepdims=True)                   # (1, 1)
    out_ref[...] = jnp.broadcast_to(
        tile_sum.reshape(1, 1, 1), out_ref.shape).astype(jnp.float32)


def focal_loss(logits, targets, alpha=None, tile_n=None):
    """logits: (N, C) float (f32 or bf16), targets: (N,) int,
    alpha: (C,) float or None -> scalar mean focal loss (f32)."""
    n, c = logits.shape
    if alpha is None:
        alpha = jnp.ones((c,), dtype=jnp.float32)

    auto_tile, vmem_limit = _plan_tiling(n, c, jnp.dtype(logits.dtype).itemsize)
    if tile_n is None:
        tile_n = auto_tile

    num_tiles = pl.cdiv(n, tile_n)
    targets2d = targets.astype(jnp.int32).reshape(n, 1)
    alpha2d = alpha.astype(jnp.float32).reshape(1, c)

    kernel = functools.partial(_focal_loss_kernel, n_total=n, tile_n=tile_n)

    partials = pl.pallas_call(
        kernel,
        out_shape=jax.ShapeDtypeStruct((num_tiles, 8, 128), jnp.float32),
        grid_spec=pltpu.PrefetchScalarGridSpec(
            num_scalar_prefetch=0,
            grid=(num_tiles,),
            in_specs=[
                pl.BlockSpec((tile_n, c), lambda i: (i, 0)),   # logits tile
                pl.BlockSpec((tile_n, 1), lambda i: (i, 0)),   # targets tile
                pl.BlockSpec((1, c), lambda i: (0, 0)),        # alpha (shared)
            ],
            out_specs=pl.BlockSpec((1, 8, 128), lambda i: (i, 0, 0)),
        ),
        compiler_params=pltpu.CompilerParams(
            # independent per-tile partial sums -> safe to shard across cores
            dimension_semantics=("parallel",),
            vmem_limit_bytes=vmem_limit,
        ),
    )(logits, targets2d, alpha2d)

    total = jnp.sum(partials[:, 0, 0])
    return total / jnp.float32(n)


def focal_loss_ref(logits, targets, alpha):
    """Pure-JAX reference matching the PyTorch FocalLoss semantics."""
    logits = logits.astype(jnp.float32)
    lse = jax.nn.logsumexp(logits, axis=-1)
    tgt_logit = jnp.take_along_axis(logits, targets[:, None], axis=-1)[:, 0]
    ce = lse - tgt_logit
    pt = jnp.exp(-ce)
    focal = (1.0 - pt) ** GAMMA * ce
    if alpha is not None:
        focal = alpha.astype(jnp.float32)[targets] * focal
    return jnp.mean(focal)


if __name__ == "__main__":
    key = jax.random.PRNGKey(0)
    k1, k2 = jax.random.split(key)

    # Small shapes; N=40 with tile_n=16 exercises multi-tile grid, "parallel"
    # per-tile partials and last-tile masking (16 + 16 + 8 valid rows).
    N, C = 40, 16
    logits = jax.random.normal(k1, (N, C), dtype=jnp.float32) * 2.0
    targets = jax.random.randint(k2, (N,), 0, C, dtype=jnp.int32)
    alpha = jnp.linspace(0.5, 1.5, C, dtype=jnp.float32)

    # multi-tile path with per-class alpha
    out = focal_loss(logits, targets, alpha, tile_n=16)
    jax.block_until_ready(out)
    ref = focal_loss_ref(logits, targets, alpha)
    assert jnp.allclose(out, ref, rtol=1e-5, atol=1e-5), (out, ref)

    # auto-tiled (single-tile) path, alpha=None branch
    out2 = focal_loss(logits, targets, None)
    jax.block_until_ready(out2)
    ref2 = focal_loss_ref(logits, targets, None)
    assert jnp.allclose(out2, ref2, rtol=1e-5, atol=1e-5), (out2, ref2)

    # bf16 logits path (halves HBM traffic; upcast to f32 inside the kernel)
    logits_bf16 = logits.astype(jnp.bfloat16)
    out3 = focal_loss(logits_bf16, targets, alpha, tile_n=16)
    jax.block_until_ready(out3)
    ref3 = focal_loss_ref(logits_bf16, targets, alpha)
    assert jnp.allclose(out3, ref3, rtol=1e-3, atol=1e-3), (out3, ref3)

    print("KERNEL_OK")
</pallas_src>

<mosaic_0001>
module attributes {stable_mosaic.version = 11 : i64} {
  func.func @_focal_loss_kernel(%arg0: i32, %arg1: memref<16x16xf32, #tpu.memory_space<vmem>>, %arg2: memref<16x1xi32, #tpu.memory_space<vmem>>, %arg3: memref<1x16xf32, #tpu.memory_space<vmem>>, %arg4: memref<1x8x128xf32, #tpu.memory_space<vmem>>) attributes {dimension_semantics = [#tpu.dimension_semantics<parallel>], iteration_bounds = array<i64: 3>, scalar_prefetch = 0 : i64, scratch_operands = 0 : i64, tpu.core_type = #tpu.core_type<tc>, window_params = [{transform_indices = @transform_0, window_bounds = array<i64: 16, 16>}, {transform_indices = @transform_1, window_bounds = array<i64: 16, 1>}, {pipeline_mode = #tpu.pipeline_mode<synchronous>, transform_indices = @transform_2, window_bounds = array<i64: 1, 16>}, {transform_indices = @transform_3, window_bounds = array<i64: 1, 8, 128>}]} {
    %c0 = arith.constant 0 : index
    %c0_0 = arith.constant 0 : index
    %0 = vector.load %arg1[%c0, %c0_0] : memref<16x16xf32, #tpu.memory_space<vmem>>, vector<16x16xf32>
    %c0_1 = arith.constant 0 : index
    %c0_2 = arith.constant 0 : index
    %1 = vector.load %arg2[%c0_1, %c0_2] : memref<16x1xi32, #tpu.memory_space<vmem>>, vector<16x1xi32>
    %c0_3 = arith.constant 0 : index
    %c0_4 = arith.constant 0 : index
    %2 = vector.load %arg3[%c0_3, %c0_4] : memref<1x16xf32, #tpu.memory_space<vmem>>, vector<1x16xf32>
    %3 = tpu.iota {dimensions = array<i32: 1>} : vector<16x16xi32>
    %4 = vector.broadcast %1 : vector<16x1xi32> to vector<16x16xi32>
    %5 = arith.cmpi eq, %3, %4 : vector<16x16xi32>
    %6 = arith.extui %5 : vector<16x16xi1> to vector<16x16xi32>
    %7 = arith.sitofp %6 : vector<16x16xi32> to vector<16x16xf32>
    %cst = arith.constant dense<0xFF800000> : vector<16xf32>
    %8 = vector.multi_reduction <maximumf>, %0, %cst [1] : vector<16x16xf32> to vector<16xf32>
    %9 = vector.shape_cast %8 : vector<16xf32> to vector<16x1xf32>
    %10 = vector.broadcast %9 : vector<16x1xf32> to vector<16x16xf32>
    %11 = arith.subf %0, %10 : vector<16x16xf32>
    %12 = math.exp %11 : vector<16x16xf32>
    %cst_5 = arith.constant dense<0.000000e+00> : vector<16xf32>
    %13 = vector.multi_reduction <add>, %12, %cst_5 [1] : vector<16x16xf32> to vector<16xf32>
    %14 = vector.shape_cast %13 : vector<16xf32> to vector<16x1xf32>
    %15 = arith.mulf %7, %0 : vector<16x16xf32>
    %cst_6 = arith.constant dense<0.000000e+00> : vector<16xf32>
    %16 = vector.multi_reduction <add>, %15, %cst_6 [1] : vector<16x16xf32> to vector<16xf32>
    %17 = vector.shape_cast %16 : vector<16xf32> to vector<16x1xf32>
    %18 = arith.mulf %7, %12 : vector<16x16xf32>
    %cst_7 = arith.constant dense<0.000000e+00> : vector<16xf32>
    %19 = vector.multi_reduction <add>, %18, %cst_7 [1] : vector<16x16xf32> to vector<16xf32>
    %20 = vector.shape_cast %19 : vector<16xf32> to vector<16x1xf32>
    %21 = arith.subf %9, %17 : vector<16x1xf32>
    %22 = math.log %14 : vector<16x1xf32>
    %23 = arith.addf %21, %22 : vector<16x1xf32>
    %24 = tpu.reciprocal %14 : vector<16x1xf32> -> vector<16x1xf32>
    %25 = arith.mulf %20, %24 : vector<16x1xf32>
    %cst_8 = arith.constant 1.000000e+00 : f32
    %26 = vector.broadcast %cst_8 : f32 to vector<16x1xf32>
    %27 = arith.subf %26, %25 : vector<16x1xf32>
    %28 = arith.mulf %27, %27 : vector<16x1xf32>
    %29 = arith.mulf %28, %23 : vector<16x1xf32>
    %30 = vector.broadcast %2 : vector<1x16xf32> to vector<16x16xf32>
    %31 = arith.mulf %7, %30 : vector<16x16xf32>
    %cst_9 = arith.constant dense<0.000000e+00> : vector<16xf32>
    %32 = vector.multi_reduction <add>, %31, %cst_9 [1] : vector<16x16xf32> to vector<16xf32>
    %33 = vector.shape_cast %32 : vector<16xf32> to vector<16x1xf32>
    %34 = arith.mulf %33, %29 : vector<16x1xf32>
    %c16_i32 = arith.constant 16 : i32
    %35 = arith.muli %arg0, %c16_i32 : i32
    %36 = tpu.iota {dimensions = array<i32: 0>} : vector<16x1xi32>
    %37 = vector.broadcast %35 : i32 to vector<16x1xi32>
    %38 = arith.addi %37, %36 : vector<16x1xi32>
    %c40_i32 = arith.constant 40 : i32
    %39 = vector.broadcast %c40_i32 : i32 to vector<16x1xi32>
    %40 = arith.cmpi slt, %38, %39 : vector<16x1xi32>
    %cst_10 = arith.constant 0.000000e+00 : f32
    %41 = vector.broadcast %cst_10 : f32 to vector<16x1xf32>
    %42 = arith.select %40, %34, %41 : vector<16x1xi1>, vector<16x1xf32>
    %cst_11 = arith.constant dense<0.000000e+00> : vector<1xf32>
    %43 = vector.multi_reduction <add>, %42, %cst_11 [0] : vector<16x1xf32> to vector<1xf32>
    %44 = vector.shape_cast %43 : vector<1xf32> to vector<1x1xf32>
    %45 = vector.shape_cast %44 : vector<1x1xf32> to vector<1x1x1xf32>
    %46 = vector.shape_cast %45 : vector<1x1x1xf32> to vector<1x1x1xf32>
    %47 = vector.broadcast %46 : vector<1x1x1xf32> to vector<1x8x128xf32>
    %c0_12 = arith.constant 0 : index
    %c0_13 = arith.constant 0 : index
    %c0_14 = arith.constant 0 : index
    %48 = vector.load %arg4[%c0_12, %c0_13, %c0_14] : memref<1x8x128xf32, #tpu.memory_space<vmem>>, vector<1x8x128xf32>
    tpu.vector_store %arg4[%c0_12, %c0_13, %c0_14], %47 {strides = array<i32>} : memref<1x8x128xf32, #tpu.memory_space<vmem>>, vector<1x8x128xf32>,
    return
  }
  func.func @transform_0(%arg0: i32) -> (i32, i32) {
    %c0_i32 = arith.constant 0 : i32
    %c0_i32_0 = arith.constant 0 : i32
    return %arg0, %c0_i32 : i32, i32
  }
  func.func @transform_1(%arg0: i32) -> (i32, i32) {
    %c0_i32 = arith.constant 0 : i32
    %c0_i32_0 = arith.constant 0 : i32
    return %arg0, %c0_i32 : i32, i32
  }
  func.func @transform_2(%arg0: i32) -> (i32, i32) {
    %c0_i32 = arith.constant 0 : i32
    %c0_i32_0 = arith.constant 0 : i32
    %c0_i32_1 = arith.constant 0 : i32
    return %c0_i32, %c0_i32_0 : i32, i32
  }
  func.func @transform_3(%arg0: i32) -> (i32, i32, i32) {
    %c0_i32 = arith.constant 0 : i32
    %c0_i32_0 = arith.constant 0 : i32
    %c0_i32_1 = arith.constant 0 : i32
    return %arg0, %c0_i32, %c0_i32_0 : i32, i32, i32
  }
}

</mosaic_0001>

<bundles_post_ra>
// kernel: tpu_custom_call.1
= control target key start
LH: loop header
LB: loop body
LE: loop exit
PB: predicated region body
PF: predicated region fallthrough
CT: control target
= control target key end

     0   :  { %8 = vsyncpa [#allocation3], 0  ;;  %s719_s0 = inlined_call_operand.vmem [shape: f32[40,16], index: 0, kind: input, shape index: {}]   ;;  %s720_s1 = inlined_call_operand.vmem [shape: s32[40,1], index: 1, kind: input, shape index: {}]   ;;  %s721_s2 = inlined_call_operand.vmem [shape: f32[1,16], index: 2, kind: input, shape index: {}]   ;;  %s722_s3 = inlined_call_operand.hbm [shape: f32[3,8,128], index: 3, kind: output, shape index: {}]  }
   0x1   :  { %10 = vsyncpa [#allocation3 + $0x1], 0  ;;  %s608_s12 = smov 0   ;;  %s610_s13 = smov 0  }
   0x2   :  { %s612_s14 = smov 0   ;;  %s614_s15 = smov 0  }
   0x3 LB: > { %s629_s16 = sadd.s32 4294967295, %s584_s15   ;;  %s450_s17 = sadd.s32 4294967294, %s584_s15   ;;  %s584_s15 = sphi %s614_s15, %s728_s15   ;;  %s580_s14 = sphi %s612_s14, %s727_s14   ;;  %s576_s13 = sphi %s610_s13, %s726_s13   ;;  %s572_s12 = sphi %s608_s12, %s725_s12  }
   0x4   : > { %s633_s18 = sadd.s32 1, %s584_s15   ;;  %s96_s19 = sadd.s32 1, %s580_s14 }
   0x5   : > { %s93_s20 = ssub.s32 %s584_s15, %s633_s18  ;;  %p106_p0 = scmp.ne.s32.totalorder %s580_s14, %s576_s13 }
   0x6   : > { %p94_p1 = scmp.eq.s32.totalorder %s93_s20, 0  ;;  %p107_p2 = scmp.eq.s32.totalorder %s629_s16, 2 }
   0x7   : > { %p112_p3 = scmp.ne.s32.totalorder %s576_s13, %s572_s12  ;;  %p113_p4 = scmp.eq.s32.totalorder %s450_s17, 2 }
   0x8   : > { %s644_s21 = scalar_select %p94_p1, %s580_s14, %s96_s19  }
   0x9   : > { %p646_p5 = por %p107_p2, %p106_p0  ;;  %p650_p6 = por %p113_p4, %p112_p3 }
   0xa   : > { %p453_p7 = scmp.ge.s32.totalorder %s584_s15, 1  ;;  %p168_p8 = scmp.lt.s32.totalorder %s584_s15, 4 }
   0xc   : > { %p169_p9 = pnand %p453_p7, %p168_p8 }
   0xd   : > { %s455_s24 = sshll.u32 (!%p169_p9), %s629_s16, 1  ;;  %s461_s7 = sshll.u32 (!%p169_p9), %s629_s16, 4 }
   0xe   : > { %172 = sbr.rel (%p169_p9) target bundleno = 321 (0x141), region = 32  ;;  %p210_p10 = scmp.lt.s32.totalorder (!%p169_p9), %s455_s24, 4 }
   0xf   : > { %s202_s8 = sand.u32 (!%p169_p9), 1, %s576_s13   ;;  %s463_s10 = sshll.u32 (!%p169_p9), %s629_s16, 3 }
  0x10   : > { %s454_s9 = sshll.u32 (!%p169_p9), %s202_s8, 3  ;;  %s374_s19 = scalar_lea.hbm (!%p169_p9), %s722_s3, %s463_s10 }
  0x11   : > { %s204_s20 = scalar_lea.vmem (!%p169_p9), [#allocation2], %s454_s9  ;;  %s364_s26 = scalar_lea.sflag (!%p169_p9), [#allocation3], %s202_s8 }
  0x12   : > { %s542_s30 = scalar_lea.hbm (!%p169_p9), %s722_s3, 24 }
  0x13   : > { %v586_v0 = vmov 0   ;;  %s730_s24 = smov (!%p210_p10, %s455_s24), 4  ;;  %vm252_vm0 = vcmask 130048   ;;  %v238_v7 = vlaneseq  ;;  %v587_v16 = vmov 0.0   ;;  %v509_v29 = vld [vmem:[%s721_s2] ss:$0 sm:$0xff] }
  0x14   : > { %507 = vset.pattern.permute.xlu1 %v586_v0  ;;  %508 = vset.pattern.permute.xlu0 %v586_v0  ;;  %s456_s25 = sshll.u32 %s730_s24, 3  ;;  %s376_s24 = sshll.u32 %s204_s20, 4  ;;  %s377_s24 = int_to_ptr.vmem [resolvable:$true] %s376_s24 }
  0x15   : > { %s213_s28 = scalar_lea.vmem %s719_s0, %s456_s25  ;;  %s227_s4 = scalar_lea.vmem %s720_s1, %s456_s25  ;;  %v239_v11 = vand.u32 127, %v238_v7  ;;  %v346_v63 = vshrl.u32 %v238_v7, 7 }
  0x16   : > { %v233_v1 = vld [vmem:[%s213_s28] sm:$0xff]  ;;  %v234_v4 = vld [vmem:[%s213_s28 + $0x8] sm:$0xff]  ;;  %s378_s25 = sshll.u32 %s374_s19, 4  ;;  %s379_s25 = int_to_ptr.hbm [resolvable:$true] %s378_s25 }
  0x17   : > { %v235_v2 = vld [vmem:[%s227_s4] sm:$0xff]  ;;  %v253_v3 = vsel %vm252_vm0, %v233_v1, -inf  ;;  %v236_v5 = vld [vmem:[%s227_s4 + $0x8] sm:$0xff]  ;;  %v256_v6 = vsel %vm252_vm0, %v234_v4, -inf  ;;  %s536_s27 = sshra.s32 %s379_s25, 4  ;;  %s537_s27 = int_to_ptr.hbm [resolvable:$true] %s536_s27 }
  0x18   : > { %241 = vperm.xlu1 %507, %v235_v2   ;;  %254 = vmax.xlane.f32.xlu0 %v253_v3  ;;  %s538_s16 = scalar_lea.hbm %s537_s27, 8  ;;  %p543_p0 = scmp.lt.s32.totalorder %s537_s27, %s722_s3 }
  0x19   : > { %p539_p11 = scmp.ne.s32.totalorder %s537_s27, %s538_s16  ;;  %p544_p1 = scmp.lt.s32.totalorder %s542_s30, %s538_s16 }
  0x1b   : > { %p540_p12 = pnand %p539_p11, %p646_p5  ;;  %p545_p2 = por %p544_p1, %p543_p0 }
  0x1d   : > { %p541_p13 = pneg %p540_p12 }
  0x1f   : > { %p546_p3 = pnand %p545_p2, %p541_p13 }
  0x20   : > { %244 = vperm.xlu1 %507, %v236_v5   ;;  %257 = vmax.xlane.f32.xlu0 %v256_v6 }
  0x8a   : > { %v242_v8 = vpop.permute.xlu1 %241 }
  0x8b   : > { %v665_v9 = vpop.xlane.xlu0 %254  ;;  %vm246_vm1 = vcmp.eq.s32.totalorder %v239_v11, %v242_v8  ;;  %v347_v8 = vadd.s32 8, %v346_v63 }
  0x8c   : > { %v259_v10 = vsub.f32 %v233_v1, %v665_v9  ;;  %v459_v17 = vsel %vm246_vm1, 1.0, %v587_v16 }
  0x8d   : > { %v271_v31 = vmul.f32 %v459_v17, %v233_v1  ;;  %v334_v35 = vmul.f32 %v509_v29, %v459_v17 }
  0x8e   : > { %v261_v12 = vmul.f32 1.442695, %v259_v10 }
  0x8f   : > { %v273_v33 = vsel %vm252_vm0, %v271_v31, 0.0  ;;  %v336_v36 = vsel %vm252_vm0, %v334_v35, 0.0 }
  0x90   : > { %510 = vpow2.f32 %v261_v12 }
  0x92   : > { %v245_v13 = vpop.permute.xlu1 %244 }
  0x93   : > { %v669_v14 = vpop.xlane.xlu0 %257  ;;  %vm247_vm2 = vcmp.eq.s32.totalorder %v239_v11, %v245_v13  ;;  %v348_v13 = vstv %s461_s7 }
  0x94   : > { %v260_v15 = vsub.f32 %v234_v4, %v669_v14  ;;  %v460_v22 = vsel %vm247_vm2, 1.0, %v587_v16  ;;  %v350_v16 = vadd.s32 %v348_v13, %v347_v8 }
  0x95   : > { %v272_v24 = vmul.f32 %v460_v22, %v234_v4  ;;  %v335_v32 = vmul.f32 %v509_v29, %v460_v22 }
  0x96   : > { %v511_v18 = vpop.eup %510  ;;  %v263_v19 = vmul.f32 1.442695, %v260_v15  ;;  %vm352_vm11 = vcmp.lt.s32.totalorder %v350_v16, 40 }
  0x97   : > { %v265_v20 = vsel %vm252_vm0, %v511_v18, 0.0  ;;  %v279_v21 = vmul.f32 %v511_v18, %v459_v17  ;;  %v276_v27 = vsel %vm252_vm0, %v272_v24, 0.0  ;;  %v339_v34 = vsel %vm252_vm0, %v335_v32, 0.0 }
  0x98   : > { %512 = vpow2.f32 %v263_v19  ;;  %266 = vadd.xlane.f32.xlu2 %v265_v20  ;;  %v349_v17 = vadd.s32 %v348_v13, %v346_v63 }
  0x99   : > { %v281_v23 = vsel %vm252_vm0, %v279_v21, 0.0 }
  0x9a   : > { %282 = vadd.xlane.f32.xlu0 %v281_v23  ;;  %vm351_vm12 = vcmp.lt.s32.totalorder %v349_v17, 40 }
  0x9e   : > { %v513_v25 = vpop.eup %512 }
  0x9f   : > { %v268_v26 = vsel %vm252_vm0, %v513_v25, 0.0  ;;  %v280_v28 = vmul.f32 %v513_v25, %v460_v22 }
  0xa0   : > { %269 = vadd.xlane.f32.xlu2 %v268_v26 }
  0xa1   : > { %v284_v30 = vsel %vm252_vm0, %v280_v28, 0.0 }
  0xa2   : > { %277 = vadd.xlane.f32.xlu0 %v276_v27  ;;  %285 = vadd.xlane.f32.xlu1 %v284_v30 }
  0xa8   : > { %274 = vadd.xlane.f32.xlu2 %v273_v33 }
  0xaa   : > { %340 = vadd.xlane.f32.xlu0 %v339_v34 }
  0xb0   : > { %337 = vadd.xlane.f32.xlu2 %v336_v36 }
 0x10b   : > { %v267_v37 = vpop.xlane.xlu2 %266 }
 0x10c   : > { %514 = vrcp.f32 %v267_v37  ;;  %v306_v42 = vand.u32 2147483648, %v267_v37  ;;  %v304_v44 = vand.u32 2147483647, %v267_v37  ;;  %vm300_vm4 = vweird.f32 %v267_v37 }
 0x10d   : > { %v283_v45 = vpop.xlane.xlu0 %282 }
 0x10e   : > { %v307_v48 = vor.u32 1.1754944e-38, %v306_v42  ;;  %vm305_vm6 = vcmp.eq.f32.partialorder %v304_v44, 8.507059e+37 }
 0x112   : > { %v515_v38 = vpop.eup %514 }
 0x113   : > { %v296_v39 = vmul.f32 %v515_v38, %v267_v37  ;;  %v270_v40 = vpop.xlane.xlu2 %269  ;;  %vm301_vm3 = vweird.f32 %v515_v38 }
 0x114   : > { %516 = vrcp.f32 %v270_v40  ;;  %vm302_vm5 = vmor %vm300_vm4, %vm301_vm3  ;;  %v320_v54 = vand.u32 2147483648, %v270_v40  ;;  %v318_v58 = vand.u32 2147483647, %v270_v40  ;;  %vm314_vm8 = vweird.f32 %v270_v40 }
 0x115   : > { %v297_v41 = vsub.f32 1.0, %v296_v39  ;;  %518 = vlog2.f32 %v267_v37  ;;  %v278_v1 = vpop.xlane.xlu0 %277  ;;  %v286_v5 = vpop.xlane.xlu1 %285 }
 0x116   : > { %520 = vlog2.f32 %v270_v40  ;;  %v321_v0 = vor.u32 1.1754944e-38, %v320_v54  ;;  %vm319_vm10 = vcmp.eq.f32.partialorder %v318_v58, 8.507059e+37 }
 0x117   : > { %v298_v43 = vmul.f32 %v515_v38, %v297_v41 }
 0x119   : > { %v299_v46 = vadd.f32 %v515_v38, %v298_v43 }
 0x11a   : > { %v517_v47 = vpop.eup %516 }
 0x11b   : > { %v303_v49 = vsel %vm302_vm5, %v515_v38, %v299_v46  ;;  %v310_v50 = vmul.f32 %v517_v47, %v270_v40  ;;  %v275_v55 = vpop.xlane.xlu2 %274  ;;  %vm315_vm7 = vweird.f32 %v517_v47  ;;  %v519_v59 = vpop.eup %518 }
 0x11c   : > { %v308_v51 = vsel %vm305_vm6, %v307_v48, %v303_v49  ;;  %v287_v61 = vsub.f32 %v665_v9, %v275_v55  ;;  %v521_v62 = vpop.eup %520  ;;  %vm316_vm9 = vmor %vm314_vm8, %vm315_vm7  ;;  %v290_v4 = vmul.f32 0.6931472, %v519_v59  ;;  %v288_v9 = vsub.f32 %v669_v14, %v278_v1 }
 0x11d   : > { %v323_v52 = vmul.f32 %v308_v51, %v283_v45  ;;  %v311_v53 = vsub.f32 1.0, %v310_v50  ;;  %v292_v11 = vmul.f32 0.6931472, %v521_v62  ;;  %v341_v23 = vpop.xlane.xlu0 %340 }
 0x11e   : > { %v293_v12 = vadd.f32 %v290_v4, %v287_v61 }
 0x11f   : > { %v325_v56 = vsub.f32 1.0, %v323_v52  ;;  %v312_v57 = vmul.f32 %v517_v47, %v311_v53  ;;  %v294_v20 = vadd.f32 %v292_v11, %v288_v9 }
 0x121   : > { %v313_v60 = vadd.f32 %v517_v47, %v312_v57  ;;  %v327_v2 = vmul.f32 %v325_v56, %v325_v56 }
 0x123   : > { %v317_v3 = vsel %vm316_vm9, %v517_v47, %v313_v60  ;;  %v329_v7 = vmul.f32 %v327_v2, %v293_v12  ;;  %v338_v18 = vpop.xlane.xlu2 %337 }
 0x124   : > { %v322_v6 = vsel %vm319_vm10, %v321_v0, %v317_v3 }
 0x125   : > { %v324_v10 = vmul.f32 %v322_v6, %v286_v5  ;;  %v342_v22 = vmul.f32 %v338_v18, %v329_v7 }
 0x127   : > { %v326_v15 = vsub.f32 1.0, %v324_v10  ;;  %v353_v26 = vsel %vm351_vm12, %v342_v22, 0.0 }
 0x129   : > { %v328_v19 = vmul.f32 %v326_v15, %v326_v15 }
 0x12b   : > { %v330_v21 = vmul.f32 %v328_v19, %v294_v20 }
 0x12d   : > { %v343_v24 = vmul.f32 %v341_v23, %v330_v21 }
 0x12f   : > { %v354_v25 = vsel %vm352_vm11, %v343_v24, 0.0 }
 0x130   : > { %v355_v27 = vadd.f32 %v354_v25, %v353_v26 }
 0x132   : > { %v356_v28 = vrot.slane %v355_v27, 4 }
 0x134   : > { %v357_v14 = vadd.f32 %v356_v28, %v355_v27 }
 0x136   : > { %v358_v29 = vrot.slane %v357_v14, 2 }
 0x138   : > { %v359_v30 = vadd.f32 %v358_v29, %v357_v14 }
 0x13a   : > { %v360_v31 = vrot.slane %v359_v30, 1 }
 0x13c   : > { %v361_v32 = vadd.f32 %v360_v31, %v359_v30 }
 0x13e   : > { %362 = vst [vmem:[%s204_s20] sm:$0xff] %v361_v32 }
 0x13f   : > { %549 = shalt.err (!%p546_p3)
}
 0x140   : > { %466 = dma.vmem_to_hbm [thread:$0]  (%p646_p5), %s377_s24, 128, %s379_s25, %s364_s26  }
 0x141 PF: > { %p472_p4 = scmp.ge.s32.totalorder %s584_s15, 2  ;;  %s390_s6 = sand.u32 1, %s572_s12  }
 0x142   : > { %s391_s7 = scalar_lea.sflag [#allocation3], %s390_s6 }
 0x143   : > { %p469_p7 = pnand %p472_p4, %p650_p6 }
 0x145   : > { %p470_p8 = pneg %p469_p7 }
 0x147   : > { %567 = dma.done.wait (%p470_p8), %s391_s7, 128  }
 0x148   : > { %569 = vsyncadd (%p470_p8), %s391_s7, 4294967168  ;;  %p13_p9 = scmp.ge.s32.totalorder %s633_s18, 5   ;;  %s725_s12 = smov %s576_s13 }
 0x149   : > { %s726_s13 = smov %s580_s14  ;;  %s727_s14 = smov %s644_s21 }
 0x14a   : > { %s728_s15 = smov %s633_s18  ;;  %15 = sbr.rel (!%p13_p9) target bundleno = 3 (0x3), region = 70 }
 0x14f   :  { %397 = vsyncpa [#allocation3], 1 }
 0x150   :  { %399 = vsyncpa [#allocation3 + $0x1], 1 }

</bundles_post_ra>
